<compile_context>
chip_gen: v7x
topology: tpu7x:2x2x1
jax: 0.10.0
libtpu: 0.0.40
codegen_flags: <defaults>
</compile_context>

<pallas_src>
import math

import numpy as np

import jax
import jax.numpy as jnp
from jax.experimental import pallas as pl
from jax.experimental.pallas import tpu as pltpu

HIDDEN = 8  # nn.Linear(1, 8) hidden width, fixed by the module


def hybrid_vqc_kernel(theta_ref, w1_ref, b1_ref, w2_ref, b2_ref, x2_ref, o_ref):
    # theta_ref : (2,)                SMEM  VQC params (theta[1] cancels in <Z>)
    # w1_ref    : (HIDDEN,)           SMEM  Linear(1, 8) weight (flattened (8, 1))
    # b1_ref    : (HIDDEN,)           SMEM  Linear(1, 8) bias
    # w2_ref    : (out_dim * HIDDEN,) SMEM  Linear(8, out) weight, row-major (out, in)
    # b2_ref    : (out_dim,)          SMEM  Linear(8, out) bias
    # x2_ref    : (1, TILE_B)         VMEM  second input feature, batch on lanes
    # o_ref     : (out_dim, TILE_B)   VMEM  Q-values, feature-major / lane-dense
    out_dim = o_ref.shape[0]

    neg_cos_t0 = -jnp.cos(theta_ref[0])                # one EUP op per tile
    ang = jnp.clip(x2_ref[...], -1.0, 1.0) * math.pi   # (1, TILE_B)
    z = neg_cos_t0 * jnp.sin(ang)                      # exact <Z> of the circuit

    # Linear(1, 8) + ReLU: pure VPU scalar*vector broadcasts.
    h = [jnp.maximum(w1_ref[k] * z + b1_ref[k], 0.0) for k in range(HIDDEN)]

    # Linear(8, out_dim): unrolled VPU accumulate (no MXU round-trip for 8xN).
    for j in range(out_dim):
        acc = b2_ref[j] + w2_ref[j * HIDDEN] * h[0]
        for k in range(1, HIDDEN):
            acc = acc + w2_ref[j * HIDDEN + k] * h[k]
        o_ref[j:j + 1, :] = acc.astype(o_ref.dtype)    # full-lane store of row j


def hybrid_vqc_forward(x, theta, w1, b1, w2, b2, *, tile_b=512):
    """Forward pass of Hybrid_VQC_nn.

    x     : (B, 2) float32, columns (x1, x2)
    theta : (2,)                       VQC parameters
    w1    : (8, 1),   b1 : (8,)        nn.Linear(1, 8)   (PyTorch (out, in) layout)
    w2    : (out, 8), b2 : (out,)      nn.Linear(8, out) (PyTorch (out, in) layout)
    returns (B, out_dim) float32
    """
    B = x.shape[0]
    out_dim, hidden = w2.shape
    assert hidden == HIDDEN and w1.shape == (HIDDEN, 1)
    assert tile_b % 128 == 0

    # Lane-dense, feature-major plumbing: only x2 is needed by the circuit.
    b_pad = ((B + tile_b - 1) // tile_b) * tile_b
    x2 = x[:, 1].astype(jnp.float32)
    if b_pad != B:
        x2 = jnp.pad(x2, (0, b_pad - B))
    x2 = x2.reshape(1, b_pad)

    theta_f = theta.astype(jnp.float32).reshape(2)
    w1_f = w1.astype(jnp.float32).reshape(HIDDEN)
    b1_f = b1.astype(jnp.float32).reshape(HIDDEN)
    w2_f = w2.astype(jnp.float32).reshape(out_dim * HIDDEN)  # row-major (out, in)
    b2_f = b2.astype(jnp.float32).reshape(out_dim)

    num_tiles = b_pad // tile_b
    smem = pltpu.MemorySpace.SMEM

    cost = pl.CostEstimate(
        flops=int(b_pad * (4 + 3 * HIDDEN + 2 * HIDDEN * out_dim)),
        transcendentals=int(b_pad + num_tiles),
        bytes_accessed=int(4 * (b_pad + out_dim * b_pad
                                + 2 + 2 * HIDDEN + out_dim * HIDDEN + out_dim)),
    )

    out_fm = pl.pallas_call(
        hybrid_vqc_kernel,
        out_shape=jax.ShapeDtypeStruct((out_dim, b_pad), jnp.float32),
        grid=(num_tiles,),
        in_specs=[
            pl.BlockSpec((2,), lambda i: (0,), memory_space=smem),                 # theta
            pl.BlockSpec((HIDDEN,), lambda i: (0,), memory_space=smem),            # w1
            pl.BlockSpec((HIDDEN,), lambda i: (0,), memory_space=smem),            # b1
            pl.BlockSpec((out_dim * HIDDEN,), lambda i: (0,), memory_space=smem),  # w2
            pl.BlockSpec((out_dim,), lambda i: (0,), memory_space=smem),           # b2
            pl.BlockSpec((1, tile_b), lambda i: (0, i)),                           # x2 (VMEM)
        ],
        out_specs=pl.BlockSpec((out_dim, tile_b), lambda i: (0, i)),
        compiler_params=pltpu.CompilerParams(dimension_semantics=("parallel",)),
        cost_estimate=cost,
    )(theta_f, w1_f, b1_f, w2_f, b2_f, x2)

    return out_fm[:, :B].T  # back to the module's (B, out_dim) layout


# ----------------------- independent reference (numpy) -----------------------

def _rx(t):
    c, s = np.cos(t / 2.0), np.sin(t / 2.0)
    return np.array([[c, -1j * s], [-1j * s, c]], dtype=np.complex128)


def _ry(t):
    c, s = np.cos(t / 2.0), np.sin(t / 2.0)
    return np.array([[c, -s], [s, c]], dtype=np.complex128)


def _rz(t):
    return np.array([[np.exp(-0.5j * t), 0.0], [0.0, np.exp(0.5j * t)]],
                    dtype=np.complex128)


_H = np.array([[1.0, 1.0], [1.0, -1.0]], dtype=np.complex128) / np.sqrt(2.0)


def _qc_expectation_z(x1, x2, thetas):
    """Exact statevector simulation of qc() (Qiskit gate conventions)."""
    a1 = float(np.clip(x1, -1.0, 1.0) * np.pi)
    a2 = float(np.clip(x2, -1.0, 1.0) * np.pi)
    psi = np.array([1.0, 0.0], dtype=np.complex128)
    for gate in (_H, _rx(a1), _ry(a2), _rx(float(thetas[0])), _rz(float(thetas[1]))):
        psi = gate @ psi
    return float(np.abs(psi[0]) ** 2 - np.abs(psi[1]) ** 2)


def reference_forward(x, theta, w1, b1, w2, b2):
    """Pure numpy reference mirroring Hybrid_VQC_nn (statevector VQC + nn.Linear)."""
    x = np.asarray(x, dtype=np.float64)
    theta = np.asarray(theta, dtype=np.float64)
    vqc = np.array([_qc_expectation_z(x1, x2, theta) for x1, x2 in x],
                   dtype=np.float64).reshape(-1, 1)
    h = np.maximum(vqc @ np.asarray(w1, np.float64).T + np.asarray(b1, np.float64), 0.0)
    return h @ np.asarray(w2, np.float64).T + np.asarray(b2, np.float64)


def init_params(key, output_dim):
    # Deterministic synthetic parameters, shapes/layout as PyTorch stores them.
    k_theta, k_w1, k_b1, k_w2, k_b2 = jax.random.split(key, 5)
    theta = (0.1 * jax.random.normal(k_theta, (2,))).astype(jnp.float32)
    # nn.Linear(1, 8): U(-1, 1), weight (out, in) = (8, 1)
    w1 = jax.random.uniform(k_w1, (HIDDEN, 1), minval=-1.0, maxval=1.0).astype(jnp.float32)
    b1 = jax.random.uniform(k_b1, (HIDDEN,), minval=-1.0, maxval=1.0).astype(jnp.float32)
    # nn.Linear(8, output_dim): U(-1/sqrt(8), 1/sqrt(8)), weight (out, in)
    lim = 1.0 / math.sqrt(HIDDEN)
    w2 = jax.random.uniform(k_w2, (output_dim, HIDDEN), minval=-lim, maxval=lim).astype(jnp.float32)
    b2 = jax.random.uniform(k_b2, (output_dim,), minval=-lim, maxval=lim).astype(jnp.float32)
    return theta, w1, b1, w2, b2


if __name__ == "__main__":
    # B large enough to exercise the batch grid + padding path (data is still tiny:
    # 8 KB in, 16 KB out).  For toy batches (e.g. B=8 in DQN action selection) this
    # op should be fused into the surrounding model rather than paying a
    # pallas_call launch per forward.
    B = 1000
    output_dim = 4
    tile_b = 512

    key = jax.random.PRNGKey(0)
    k_x, k_p = jax.random.split(key)
    # exercise the clip(-1, 1) path with values outside [-1, 1]
    x = jax.random.uniform(k_x, (B, 2), minval=-1.5, maxval=1.5).astype(jnp.float32)
    theta, w1, b1, w2, b2 = init_params(k_p, output_dim)

    out = hybrid_vqc_forward(x, theta, w1, b1, w2, b2, tile_b=tile_b)
    out = jax.block_until_ready(out)

    ref = reference_forward(np.asarray(x), np.asarray(theta), np.asarray(w1),
                            np.asarray(b1), np.asarray(w2), np.asarray(b2))

    assert out.shape == (B, output_dim) and out.dtype == jnp.float32
    assert np.allclose(np.asarray(out), ref, atol=1e-4, rtol=1e-4), (
        float(np.max(np.abs(np.asarray(out) - ref))))

    print("KERNEL_OK")
</pallas_src>

<mosaic_0001>
module attributes {stable_mosaic.version = 11 : i64} {
  func.func @hybrid_vqc_kernel(%arg0: i32, %arg1: memref<2xf32, #tpu.memory_space<smem>>, %arg2: memref<8xf32, #tpu.memory_space<smem>>, %arg3: memref<8xf32, #tpu.memory_space<smem>>, %arg4: memref<32xf32, #tpu.memory_space<smem>>, %arg5: memref<4xf32, #tpu.memory_space<smem>>, %arg6: memref<1x512xf32, #tpu.memory_space<vmem>>, %arg7: memref<4x512xf32, #tpu.memory_space<vmem>>) attributes {dimension_semantics = [#tpu.dimension_semantics<parallel>], iteration_bounds = array<i64: 2>, scalar_prefetch = 0 : i64, scratch_operands = 0 : i64, tpu.core_type = #tpu.core_type<tc>, window_params = [{transform_indices = @transform_0, window_bounds = array<i64: 2>}, {transform_indices = @transform_1, window_bounds = array<i64: 8>}, {transform_indices = @transform_2, window_bounds = array<i64: 8>}, {transform_indices = @transform_3, window_bounds = array<i64: 32>}, {transform_indices = @transform_4, window_bounds = array<i64: 4>}, {transform_indices = @transform_5, window_bounds = array<i64: 1, 512>}, {transform_indices = @transform_6, window_bounds = array<i64: 4, 512>}]} {
    %c0 = arith.constant 0 : index
    %0 = memref.load %arg1[%c0] : memref<2xf32, #tpu.memory_space<smem>>
    %1 = math.cos %0 : f32
    %cst = arith.constant 0.000000e+00 : f32
    %2 = arith.subf %cst, %1 : f32
    %c0_0 = arith.constant 0 : index
    %c0_1 = arith.constant 0 : index
    %3 = vector.load %arg6[%c0_0, %c0_1] : memref<1x512xf32, #tpu.memory_space<vmem>>, vector<1x512xf32>
    %cst_2 = arith.constant -1.000000e+00 : f32
    %cst_3 = arith.constant 1.000000e+00 : f32
    %4 = vector.broadcast %cst_2 : f32 to vector<1x512xf32>
    %5 = arith.maximumf %4, %3 : vector<1x512xf32>
    %6 = vector.broadcast %cst_3 : f32 to vector<1x512xf32>
    %7 = arith.minimumf %6, %5 : vector<1x512xf32>
    %cst_4 = arith.constant 3.14159274 : f32
    %8 = vector.broadcast %cst_4 : f32 to vector<1x512xf32>
    %9 = arith.mulf %7, %8 : vector<1x512xf32>
    %10 = math.sin %9 : vector<1x512xf32>
    %11 = vector.broadcast %2 : f32 to vector<1x512xf32>
    %12 = arith.mulf %11, %10 : vector<1x512xf32>
    %c0_5 = arith.constant 0 : index
    %13 = memref.load %arg2[%c0_5] : memref<8xf32, #tpu.memory_space<smem>>
    %14 = vector.broadcast %13 : f32 to vector<1x512xf32>
    %15 = arith.mulf %14, %12 : vector<1x512xf32>
    %c0_6 = arith.constant 0 : index
    %16 = memref.load %arg3[%c0_6] : memref<8xf32, #tpu.memory_space<smem>>
    %17 = vector.broadcast %16 : f32 to vector<1x512xf32>
    %18 = arith.addf %15, %17 : vector<1x512xf32>
    %cst_7 = arith.constant 0.000000e+00 : f32
    %19 = vector.broadcast %cst_7 : f32 to vector<1x512xf32>
    %20 = arith.maximumf %18, %19 : vector<1x512xf32>
    %c1 = arith.constant 1 : index
    %21 = memref.load %arg2[%c1] : memref<8xf32, #tpu.memory_space<smem>>
    %22 = vector.broadcast %21 : f32 to vector<1x512xf32>
    %23 = arith.mulf %22, %12 : vector<1x512xf32>
    %c1_8 = arith.constant 1 : index
    %24 = memref.load %arg3[%c1_8] : memref<8xf32, #tpu.memory_space<smem>>
    %25 = vector.broadcast %24 : f32 to vector<1x512xf32>
    %26 = arith.addf %23, %25 : vector<1x512xf32>
    %cst_9 = arith.constant 0.000000e+00 : f32
    %27 = vector.broadcast %cst_9 : f32 to vector<1x512xf32>
    %28 = arith.maximumf %26, %27 : vector<1x512xf32>
    %c2 = arith.constant 2 : index
    %29 = memref.load %arg2[%c2] : memref<8xf32, #tpu.memory_space<smem>>
    %30 = vector.broadcast %29 : f32 to vector<1x512xf32>
    %31 = arith.mulf %30, %12 : vector<1x512xf32>
    %c2_10 = arith.constant 2 : index
    %32 = memref.load %arg3[%c2_10] : memref<8xf32, #tpu.memory_space<smem>>
    %33 = vector.broadcast %32 : f32 to vector<1x512xf32>
    %34 = arith.addf %31, %33 : vector<1x512xf32>
    %cst_11 = arith.constant 0.000000e+00 : f32
    %35 = vector.broadcast %cst_11 : f32 to vector<1x512xf32>
    %36 = arith.maximumf %34, %35 : vector<1x512xf32>
    %c3 = arith.constant 3 : index
    %37 = memref.load %arg2[%c3] : memref<8xf32, #tpu.memory_space<smem>>
    %38 = vector.broadcast %37 : f32 to vector<1x512xf32>
    %39 = arith.mulf %38, %12 : vector<1x512xf32>
    %c3_12 = arith.constant 3 : index
    %40 = memref.load %arg3[%c3_12] : memref<8xf32, #tpu.memory_space<smem>>
    %41 = vector.broadcast %40 : f32 to vector<1x512xf32>
    %42 = arith.addf %39, %41 : vector<1x512xf32>
    %cst_13 = arith.constant 0.000000e+00 : f32
    %43 = vector.broadcast %cst_13 : f32 to vector<1x512xf32>
    %44 = arith.maximumf %42, %43 : vector<1x512xf32>
    %c4 = arith.constant 4 : index
    %45 = memref.load %arg2[%c4] : memref<8xf32, #tpu.memory_space<smem>>
    %46 = vector.broadcast %45 : f32 to vector<1x512xf32>
    %47 = arith.mulf %46, %12 : vector<1x512xf32>
    %c4_14 = arith.constant 4 : index
    %48 = memref.load %arg3[%c4_14] : memref<8xf32, #tpu.memory_space<smem>>
    %49 = vector.broadcast %48 : f32 to vector<1x512xf32>
    %50 = arith.addf %47, %49 : vector<1x512xf32>
    %cst_15 = arith.constant 0.000000e+00 : f32
    %51 = vector.broadcast %cst_15 : f32 to vector<1x512xf32>
    %52 = arith.maximumf %50, %51 : vector<1x512xf32>
    %c5 = arith.constant 5 : index
    %53 = memref.load %arg2[%c5] : memref<8xf32, #tpu.memory_space<smem>>
    %54 = vector.broadcast %53 : f32 to vector<1x512xf32>
    %55 = arith.mulf %54, %12 : vector<1x512xf32>
    %c5_16 = arith.constant 5 : index
    %56 = memref.load %arg3[%c5_16] : memref<8xf32, #tpu.memory_space<smem>>
    %57 = vector.broadcast %56 : f32 to vector<1x512xf32>
    %58 = arith.addf %55, %57 : vector<1x512xf32>
    %cst_17 = arith.constant 0.000000e+00 : f32
    %59 = vector.broadcast %cst_17 : f32 to vector<1x512xf32>
    %60 = arith.maximumf %58, %59 : vector<1x512xf32>
    %c6 = arith.constant 6 : index
    %61 = memref.load %arg2[%c6] : memref<8xf32, #tpu.memory_space<smem>>
    %62 = vector.broadcast %61 : f32 to vector<1x512xf32>
    %63 = arith.mulf %62, %12 : vector<1x512xf32>
    %c6_18 = arith.constant 6 : index
    %64 = memref.load %arg3[%c6_18] : memref<8xf32, #tpu.memory_space<smem>>
    %65 = vector.broadcast %64 : f32 to vector<1x512xf32>
    %66 = arith.addf %63, %65 : vector<1x512xf32>
    %cst_19 = arith.constant 0.000000e+00 : f32
    %67 = vector.broadcast %cst_19 : f32 to vector<1x512xf32>
    %68 = arith.maximumf %66, %67 : vector<1x512xf32>
    %c7 = arith.constant 7 : index
    %69 = memref.load %arg2[%c7] : memref<8xf32, #tpu.memory_space<smem>>
    %70 = vector.broadcast %69 : f32 to vector<1x512xf32>
    %71 = arith.mulf %70, %12 : vector<1x512xf32>
    %c7_20 = arith.constant 7 : index
    %72 = memref.load %arg3[%c7_20] : memref<8xf32, #tpu.memory_space<smem>>
    %73 = vector.broadcast %72 : f32 to vector<1x512xf32>
    %74 = arith.addf %71, %73 : vector<1x512xf32>
    %cst_21 = arith.constant 0.000000e+00 : f32
    %75 = vector.broadcast %cst_21 : f32 to vector<1x512xf32>
    %76 = arith.maximumf %74, %75 : vector<1x512xf32>
    %c0_22 = arith.constant 0 : index
    %77 = memref.load %arg5[%c0_22] : memref<4xf32, #tpu.memory_space<smem>>
    %c0_23 = arith.constant 0 : index
    %78 = memref.load %arg4[%c0_23] : memref<32xf32, #tpu.memory_space<smem>>
    %79 = vector.broadcast %78 : f32 to vector<1x512xf32>
    %80 = arith.mulf %79, %20 : vector<1x512xf32>
    %81 = vector.broadcast %77 : f32 to vector<1x512xf32>
    %82 = arith.addf %81, %80 : vector<1x512xf32>
    %c1_24 = arith.constant 1 : index
    %83 = memref.load %arg4[%c1_24] : memref<32xf32, #tpu.memory_space<smem>>
    %84 = vector.broadcast %83 : f32 to vector<1x512xf32>
    %85 = arith.mulf %84, %28 : vector<1x512xf32>
    %86 = arith.addf %82, %85 : vector<1x512xf32>
    %c2_25 = arith.constant 2 : index
    %87 = memref.load %arg4[%c2_25] : memref<32xf32, #tpu.memory_space<smem>>
    %88 = vector.broadcast %87 : f32 to vector<1x512xf32>
    %89 = arith.mulf %88, %36 : vector<1x512xf32>
    %90 = arith.addf %86, %89 : vector<1x512xf32>
    %c3_26 = arith.constant 3 : index
    %91 = memref.load %arg4[%c3_26] : memref<32xf32, #tpu.memory_space<smem>>
    %92 = vector.broadcast %91 : f32 to vector<1x512xf32>
    %93 = arith.mulf %92, %44 : vector<1x512xf32>
    %94 = arith.addf %90, %93 : vector<1x512xf32>
    %c4_27 = arith.constant 4 : index
    %95 = memref.load %arg4[%c4_27] : memref<32xf32, #tpu.memory_space<smem>>
    %96 = vector.broadcast %95 : f32 to vector<1x512xf32>
    %97 = arith.mulf %96, %52 : vector<1x512xf32>
    %98 = arith.addf %94, %97 : vector<1x512xf32>
    %c5_28 = arith.constant 5 : index
    %99 = memref.load %arg4[%c5_28] : memref<32xf32, #tpu.memory_space<smem>>
    %100 = vector.broadcast %99 : f32 to vector<1x512xf32>
    %101 = arith.mulf %100, %60 : vector<1x512xf32>
    %102 = arith.addf %98, %101 : vector<1x512xf32>
    %c6_29 = arith.constant 6 : index
    %103 = memref.load %arg4[%c6_29] : memref<32xf32, #tpu.memory_space<smem>>
    %104 = vector.broadcast %103 : f32 to vector<1x512xf32>
    %105 = arith.mulf %104, %68 : vector<1x512xf32>
    %106 = arith.addf %102, %105 : vector<1x512xf32>
    %c7_30 = arith.constant 7 : index
    %107 = memref.load %arg4[%c7_30] : memref<32xf32, #tpu.memory_space<smem>>
    %108 = vector.broadcast %107 : f32 to vector<1x512xf32>
    %109 = arith.mulf %108, %76 : vector<1x512xf32>
    %110 = arith.addf %106, %109 : vector<1x512xf32>
    %c0_31 = arith.constant 0 : index
    %c0_32 = arith.constant 0 : index
    %111 = vector.load %arg7[%c0_31, %c0_32] : memref<4x512xf32, #tpu.memory_space<vmem>>, vector<1x512xf32>
    tpu.vector_store %arg7[%c0_31, %c0_32], %110 {strides = array<i32>} : memref<4x512xf32, #tpu.memory_space<vmem>>, vector<1x512xf32>,
    %c1_33 = arith.constant 1 : index
    %112 = memref.load %arg5[%c1_33] : memref<4xf32, #tpu.memory_space<smem>>
    %c8 = arith.constant 8 : index
    %113 = memref.load %arg4[%c8] : memref<32xf32, #tpu.memory_space<smem>>
    %114 = vector.broadcast %113 : f32 to vector<1x512xf32>
    %115 = arith.mulf %114, %20 : vector<1x512xf32>
    %116 = vector.broadcast %112 : f32 to vector<1x512xf32>
    %117 = arith.addf %116, %115 : vector<1x512xf32>
    %c9 = arith.constant 9 : index
    %118 = memref.load %arg4[%c9] : memref<32xf32, #tpu.memory_space<smem>>
    %119 = vector.broadcast %118 : f32 to vector<1x512xf32>
    %120 = arith.mulf %119, %28 : vector<1x512xf32>
    %121 = arith.addf %117, %120 : vector<1x512xf32>
    %c10 = arith.constant 10 : index
    %122 = memref.load %arg4[%c10] : memref<32xf32, #tpu.memory_space<smem>>
    %123 = vector.broadcast %122 : f32 to vector<1x512xf32>
    %124 = arith.mulf %123, %36 : vector<1x512xf32>
    %125 = arith.addf %121, %124 : vector<1x512xf32>
    %c11 = arith.constant 11 : index
    %126 = memref.load %arg4[%c11] : memref<32xf32, #tpu.memory_space<smem>>
    %127 = vector.broadcast %126 : f32 to vector<1x512xf32>
    %128 = arith.mulf %127, %44 : vector<1x512xf32>
    %129 = arith.addf %125, %128 : vector<1x512xf32>
    %c12 = arith.constant 12 : index
    %130 = memref.load %arg4[%c12] : memref<32xf32, #tpu.memory_space<smem>>
    %131 = vector.broadcast %130 : f32 to vector<1x512xf32>
    %132 = arith.mulf %131, %52 : vector<1x512xf32>
    %133 = arith.addf %129, %132 : vector<1x512xf32>
    %c13 = arith.constant 13 : index
    %134 = memref.load %arg4[%c13] : memref<32xf32, #tpu.memory_space<smem>>
    %135 = vector.broadcast %134 : f32 to vector<1x512xf32>
    %136 = arith.mulf %135, %60 : vector<1x512xf32>
    %137 = arith.addf %133, %136 : vector<1x512xf32>
    %c14 = arith.constant 14 : index
    %138 = memref.load %arg4[%c14] : memref<32xf32, #tpu.memory_space<smem>>
    %139 = vector.broadcast %138 : f32 to vector<1x512xf32>
    %140 = arith.mulf %139, %68 : vector<1x512xf32>
    %141 = arith.addf %137, %140 : vector<1x512xf32>
    %c15 = arith.constant 15 : index
    %142 = memref.load %arg4[%c15] : memref<32xf32, #tpu.memory_space<smem>>
    %143 = vector.broadcast %142 : f32 to vector<1x512xf32>
    %144 = arith.mulf %143, %76 : vector<1x512xf32>
    %145 = arith.addf %141, %144 : vector<1x512xf32>
    %c1_34 = arith.constant 1 : index
    %c0_35 = arith.constant 0 : index
    %146 = vector.load %arg7[%c1_34, %c0_35] : memref<4x512xf32, #tpu.memory_space<vmem>>, vector<1x512xf32>
    tpu.vector_store %arg7[%c1_34, %c0_35], %145 {strides = array<i32>} : memref<4x512xf32, #tpu.memory_space<vmem>>, vector<1x512xf32>,
    %c2_36 = arith.constant 2 : index
    %147 = memref.load %arg5[%c2_36] : memref<4xf32, #tpu.memory_space<smem>>
    %c16 = arith.constant 16 : index
    %148 = memref.load %arg4[%c16] : memref<32xf32, #tpu.memory_space<smem>>
    %149 = vector.broadcast %148 : f32 to vector<1x512xf32>
    %150 = arith.mulf %149, %20 : vector<1x512xf32>
    %151 = vector.broadcast %147 : f32 to vector<1x512xf32>
    %152 = arith.addf %151, %150 : vector<1x512xf32>
    %c17 = arith.constant 17 : index
    %153 = memref.load %arg4[%c17] : memref<32xf32, #tpu.memory_space<smem>>
    %154 = vector.broadcast %153 : f32 to vector<1x512xf32>
    %155 = arith.mulf %154, %28 : vector<1x512xf32>
    %156 = arith.addf %152, %155 : vector<1x512xf32>
    %c18 = arith.constant 18 : index
    %157 = memref.load %arg4[%c18] : memref<32xf32, #tpu.memory_space<smem>>
    %158 = vector.broadcast %157 : f32 to vector<1x512xf32>
    %159 = arith.mulf %158, %36 : vector<1x512xf32>
    %160 = arith.addf %156, %159 : vector<1x512xf32>
    %c19 = arith.constant 19 : index
    %161 = memref.load %arg4[%c19] : memref<32xf32, #tpu.memory_space<smem>>
    %162 = vector.broadcast %161 : f32 to vector<1x512xf32>
    %163 = arith.mulf %162, %44 : vector<1x512xf32>
    %164 = arith.addf %160, %163 : vector<1x512xf32>
    %c20 = arith.constant 20 : index
    %165 = memref.load %arg4[%c20] : memref<32xf32, #tpu.memory_space<smem>>
    %166 = vector.broadcast %165 : f32 to vector<1x512xf32>
    %167 = arith.mulf %166, %52 : vector<1x512xf32>
    %168 = arith.addf %164, %167 : vector<1x512xf32>
    %c21 = arith.constant 21 : index
    %169 = memref.load %arg4[%c21] : memref<32xf32, #tpu.memory_space<smem>>
    %170 = vector.broadcast %169 : f32 to vector<1x512xf32>
    %171 = arith.mulf %170, %60 : vector<1x512xf32>
    %172 = arith.addf %168, %171 : vector<1x512xf32>
    %c22 = arith.constant 22 : index
    %173 = memref.load %arg4[%c22] : memref<32xf32, #tpu.memory_space<smem>>
    %174 = vector.broadcast %173 : f32 to vector<1x512xf32>
    %175 = arith.mulf %174, %68 : vector<1x512xf32>
    %176 = arith.addf %172, %175 : vector<1x512xf32>
    %c23 = arith.constant 23 : index
    %177 = memref.load %arg4[%c23] : memref<32xf32, #tpu.memory_space<smem>>
    %178 = vector.broadcast %177 : f32 to vector<1x512xf32>
    %179 = arith.mulf %178, %76 : vector<1x512xf32>
    %180 = arith.addf %176, %179 : vector<1x512xf32>
    %c2_37 = arith.constant 2 : index
    %c0_38 = arith.constant 0 : index
    %181 = vector.load %arg7[%c2_37, %c0_38] : memref<4x512xf32, #tpu.memory_space<vmem>>, vector<1x512xf32>
    tpu.vector_store %arg7[%c2_37, %c0_38], %180 {strides = array<i32>} : memref<4x512xf32, #tpu.memory_space<vmem>>, vector<1x512xf32>,
    %c3_39 = arith.constant 3 : index
    %182 = memref.load %arg5[%c3_39] : memref<4xf32, #tpu.memory_space<smem>>
    %c24 = arith.constant 24 : index
    %183 = memref.load %arg4[%c24] : memref<32xf32, #tpu.memory_space<smem>>
    %184 = vector.broadcast %183 : f32 to vector<1x512xf32>
    %185 = arith.mulf %184, %20 : vector<1x512xf32>
    %186 = vector.broadcast %182 : f32 to vector<1x512xf32>
    %187 = arith.addf %186, %185 : vector<1x512xf32>
    %c25 = arith.constant 25 : index
    %188 = memref.load %arg4[%c25] : memref<32xf32, #tpu.memory_space<smem>>
    %189 = vector.broadcast %188 : f32 to vector<1x512xf32>
    %190 = arith.mulf %189, %28 : vector<1x512xf32>
    %191 = arith.addf %187, %190 : vector<1x512xf32>
    %c26 = arith.constant 26 : index
    %192 = memref.load %arg4[%c26] : memref<32xf32, #tpu.memory_space<smem>>
    %193 = vector.broadcast %192 : f32 to vector<1x512xf32>
    %194 = arith.mulf %193, %36 : vector<1x512xf32>
    %195 = arith.addf %191, %194 : vector<1x512xf32>
    %c27 = arith.constant 27 : index
    %196 = memref.load %arg4[%c27] : memref<32xf32, #tpu.memory_space<smem>>
    %197 = vector.broadcast %196 : f32 to vector<1x512xf32>
    %198 = arith.mulf %197, %44 : vector<1x512xf32>
    %199 = arith.addf %195, %198 : vector<1x512xf32>
    %c28 = arith.constant 28 : index
    %200 = memref.load %arg4[%c28] : memref<32xf32, #tpu.memory_space<smem>>
    %201 = vector.broadcast %200 : f32 to vector<1x512xf32>
    %202 = arith.mulf %201, %52 : vector<1x512xf32>
    %203 = arith.addf %199, %202 : vector<1x512xf32>
    %c29 = arith.constant 29 : index
    %204 = memref.load %arg4[%c29] : memref<32xf32, #tpu.memory_space<smem>>
    %205 = vector.broadcast %204 : f32 to vector<1x512xf32>
    %206 = arith.mulf %205, %60 : vector<1x512xf32>
    %207 = arith.addf %203, %206 : vector<1x512xf32>
    %c30 = arith.constant 30 : index
    %208 = memref.load %arg4[%c30] : memref<32xf32, #tpu.memory_space<smem>>
    %209 = vector.broadcast %208 : f32 to vector<1x512xf32>
    %210 = arith.mulf %209, %68 : vector<1x512xf32>
    %211 = arith.addf %207, %210 : vector<1x512xf32>
    %c31 = arith.constant 31 : index
    %212 = memref.load %arg4[%c31] : memref<32xf32, #tpu.memory_space<smem>>
    %213 = vector.broadcast %212 : f32 to vector<1x512xf32>
    %214 = arith.mulf %213, %76 : vector<1x512xf32>
    %215 = arith.addf %211, %214 : vector<1x512xf32>
    %c3_40 = arith.constant 3 : index
    %c0_41 = arith.constant 0 : index
    %216 = vector.load %arg7[%c3_40, %c0_41] : memref<4x512xf32, #tpu.memory_space<vmem>>, vector<1x512xf32>
    tpu.vector_store %arg7[%c3_40, %c0_41], %215 {strides = array<i32>} : memref<4x512xf32, #tpu.memory_space<vmem>>, vector<1x512xf32>,
    return
  }
  func.func @transform_0(%arg0: i32) -> i32 {
    %c0_i32 = arith.constant 0 : i32
    %c0_i32_0 = arith.constant 0 : i32
    return %c0_i32 : i32
  }
  func.func @transform_1(%arg0: i32) -> i32 {
    %c0_i32 = arith.constant 0 : i32
    %c0_i32_0 = arith.constant 0 : i32
    return %c0_i32 : i32
  }
  func.func @transform_2(%arg0: i32) -> i32 {
    %c0_i32 = arith.constant 0 : i32
    %c0_i32_0 = arith.constant 0 : i32
    return %c0_i32 : i32
  }
  func.func @transform_3(%arg0: i32) -> i32 {
    %c0_i32 = arith.constant 0 : i32
    %c0_i32_0 = arith.constant 0 : i32
    return %c0_i32 : i32
  }
  func.func @transform_4(%arg0: i32) -> i32 {
    %c0_i32 = arith.constant 0 : i32
    %c0_i32_0 = arith.constant 0 : i32
    return %c0_i32 : i32
  }
  func.func @transform_5(%arg0: i32) -> (i32, i32) {
    %c0_i32 = arith.constant 0 : i32
    %c0_i32_0 = arith.constant 0 : i32
    return %c0_i32, %arg0 : i32, i32
  }
  func.func @transform_6(%arg0: i32) -> (i32, i32) {
    %c0_i32 = arith.constant 0 : i32
    %c0_i32_0 = arith.constant 0 : i32
    return %c0_i32, %arg0 : i32, i32
  }
}

</mosaic_0001>

<bundles_post_ra>
// kernel: tpu_custom_call.1
= control target key start
LH: loop header
LB: loop body
LE: loop exit
PB: predicated region body
PF: predicated region fallthrough
CT: control target
= control target key end

     0   :  { %s1760_s0 = inlined_call_operand.hbm [shape: f32[2], index: 0, kind: input, shape index: {}]   ;;  %s1761_s1 = inlined_call_operand.vmem [shape: f32[8], index: 1, kind: input, shape index: {}]   ;;  %s1762_s2 = inlined_call_operand.vmem [shape: f32[8], index: 2, kind: input, shape index: {}]   ;;  %s1763_s3 = inlined_call_operand.vmem [shape: f32[32], index: 3, kind: input, shape index: {}]   ;;  %s1764_s4 = inlined_call_operand.vmem [shape: f32[4], index: 4, kind: input, shape index: {}]   ;;  %s1765_s5 = inlined_call_operand.vmem [shape: f32[1,1024], index: 5, kind: input, shape index: {}]   ;;  %s1766_s6 = inlined_call_operand.hbm [shape: f32[4,1024], index: 6, kind: output, shape index: {}]  }
   0x1   :  { %1791 = sst [smem:[#allocation39_spill]] %s1760_s0 }
   0x2   :  { %1792 = sst [smem:[#allocation40_spill]] %s1761_s1 }
   0x3   :  { %1793 = sst [smem:[#allocation41_spill]] %s1762_s2 }
   0x4   :  { %1794 = sst [smem:[#allocation42_spill]] %s1763_s3 }
   0x5   :  { %1795 = sst [smem:[#allocation43_spill]] %s1764_s4 }
   0x6   :  { %1796 = sst [smem:[#allocation44_spill]] %s1765_s5 }
   0x7   :  { %1797 = sst [smem:[#allocation45_spill]] %s1766_s6 }
   0x8   :  { %11 = vsyncpa [#allocation4], 0 }
   0x9   :  { %12 = vsyncpa [#allocation5], 0 }
   0xa   :  { %13 = vsyncpa [#allocation8], 0 }
   0xb   :  { %14 = vsyncpa [#allocation11], 0 }
   0xc   :  { %15 = vsyncpa [#allocation3], 0 }
   0xd   :  { %17 = vsyncpa [#allocation3 + $0x1], 0  ;;  %s1253_s21 = smov 0   ;;  %s1255_s22 = smov 0  }
   0xe   :  { %s1257_s23 = smov 0   ;;  %s1259_s24 = smov 0  }
   0xf LB: > { %1798 = sst [smem:[#allocation18_spill]] %s1192_s21  ;;  %s1274_s25 = sadd.s32 4294967295, %s1204_s24   ;;  %s1204_s24 = sphi %s1259_s24, %s1862_s24   ;;  %s1200_s23 = sphi %s1257_s23, %s1865_s23   ;;  %s1196_s22 = sphi %s1255_s22, %s1864_s22   ;;  %s1192_s21 = sphi %s1253_s21, %s1863_s21  }
  0x10   : > { %1799 = sst [smem:[#allocation19_spill]] %s1196_s22  ;;  %s857_s26 = sadd.s32 4294967294, %s1204_s24  }
  0x11   : > { %1800 = sst [smem:[#allocation20_spill]] %s1200_s23  ;;  %s1278_s27 = sadd.s32 1, %s1204_s24  }
  0x12   : > { %1801 = sst [smem:[#allocation21_spill]] %s1204_s24  ;;  %s161_s28 = sadd.s32 1, %s1200_s23 }
  0x13   : > { %1802 = sst [smem:[#allocation22_spill]] %s1274_s25  ;;  %s158_s29 = ssub.s32 %s1204_s24, %s1278_s27 }
  0x14   : > { %1803 = sst [smem:[#allocation23_spill]] %s1278_s27  ;;  %p171_p0 = scmp.ne.s32.totalorder %s1200_s23, %s1196_s22 }
  0x15   : > { %p159_p1 = scmp.eq.s32.totalorder %s158_s29, 0  ;;  %p172_p2 = scmp.eq.s32.totalorder %s1274_s25, 1 }
  0x16   : > { %p177_p3 = scmp.ne.s32.totalorder %s1196_s22, %s1192_s21  ;;  %p178_p4 = scmp.eq.s32.totalorder %s857_s26, 1 }
  0x17   : > { %s1289_s30 = scalar_select %p159_p1, %s1200_s23, %s161_s28  }
  0x18   : > { %p1291_p5 = por %p172_p2, %p171_p0  ;;  %p1295_p6 = por %p178_p4, %p177_p3 }
  0x19   : > { %1804 = sst [smem:[#allocation24_spill]] %s1289_s30  ;;  %p858_p7 = scmp.ge.s32.totalorder %s1204_s24, 1 }
  0x1a   : > { %s1805_s7 = scalar_select %p1291_p5, 1, 0 }
  0x1b   : > { %s1807_s8 = scalar_select %p1295_p6, 1, 0 }
  0x1c   : > { %1806 = sst [smem:[#allocation25_spill]] %s1805_s7  ;;  %p185_p8 = scmp.lt.s32.totalorder %s1204_s24, 3 }
  0x1d   : > { %1808 = sst [smem:[#allocation26_spill]] %s1807_s8  ;;  %p1767_p9 = scmp.eq.s32.totalorder %s1274_s25, 0 }
  0x1e   : > { %p1302_p10 = pnand %p858_p7, %p185_p8  ;;  %s1810_s2 = sld [smem:[#allocation41_spill]] }
  0x1f   : > { %s1811_s1 = sld [smem:[#allocation40_spill]]  ;;  %s1813_s3 = sld [smem:[#allocation42_spill]] }
  0x20   : > { %p971_p11 = pneg %p1302_p10 }
  0x22   : > { %p1316_p12 = pnand %p1767_p9, %p971_p11 }
  0x24   : > { %s218_s12 = sshll.u32 %s1810_s2, 4  ;;  %p1329_p0 = pneg %p1316_p12  ;;  %s219_s12 = int_to_ptr.vmem [resolvable:$true] %s218_s12 }
  0x25   : > { %s207_s15 = sshll.u32 %s1811_s1, 4  ;;  %s229_s19 = sshll.u32 %s1813_s3, 4  ;;  %s1320_s15 = int_to_ptr.vmem [resolvable:$true] %s207_s15  ;;  %s1325_s19 = int_to_ptr.vmem [resolvable:$true] %s229_s19 }
  0x26   : > { %s1053_s20 = scalar_lea.vmem %s219_s12, 16  ;;  %p1061_p3 = scmp.lt.s32.totalorder %s219_s12, %s219_s12 }
  0x27   : > { %p1054_p13 = scmp.ne.s32.totalorder %s219_s12, %s1053_s20  ;;  %p1062_p4 = scmp.lt.s32.totalorder %s1053_s20, %s1053_s20 }
  0x29   : > { %p1056_p1 = pnand %p1329_p0, %p1054_p13  ;;  %p1063_p7 = por %p1062_p4, %p1061_p3 }
  0x2b   : > { %p1057_p2 = pneg %p1056_p1 }
  0x2d   : > { %p1064_p8 = pnand %p1063_p7, %p1057_p2 }
  0x2f   : > { %1067 = shalt.err (!%p1064_p8)
}
  0x30   : > { %s1206_s28 = smov [#allocation7]   ;;  %s1815_s0 = sld [smem:[#allocation39_spill]] }
  0x31   : > { %980 = dma.vmem_to_smem (!%p1316_p12), %s219_s12, 16, %s1206_s28, [#allocation8]  }
  0x36   : > { %s1068_s11 = scalar_lea.hbm %s1815_s0, 16 }
  0x37   : > { %p1069_p11 = scmp.ne.s32.totalorder %s1815_s0, %s1068_s11  ;;  %p1075_p2 = scmp.lt.u32.totalorder %s1068_s11, %s1815_s0 }
  0x39   : > { %p1071_p13 = pnand %p1069_p11, %p1329_p0 }
  0x3b   : > { %p1072_p1 = pneg %p1071_p13 }
  0x3d   : > { %p1077_p3 = pnand %p1075_p2, %p1072_p1 }
  0x3f   : > { %1080 = shalt.err (!%p1077_p3)
}
  0x40   : > { %s1207_s20 = smov [#allocation2]   ;;  %s1081_s29 = scalar_lea.vmem %s1320_s15, 16 }
  0x41   : > { %974 = dma.hbm_to_smem (!%p1316_p12), %s1815_s0, 16, %s1207_s20, [#allocation4]  }
  0x42   : > { %p1082_p4 = scmp.ne.s32.totalorder %s1320_s15, %s1081_s29  ;;  %p1089_p11 = scmp.lt.s32.totalorder %s1320_s15, %s1320_s15 }
  0x43   : > { %p1090_p13 = scmp.lt.s32.totalorder %s1081_s29, %s1081_s29 }
  0x44   : > { %p1084_p7 = pnand %p1082_p4, %p1329_p0 }
  0x45   : > { %p1091_p1 = por %p1090_p13, %p1089_p11 }
  0x46   : > { %p1085_p8 = pneg %p1084_p7 }
  0x48   : > { %p1092_p2 = pnand %p1091_p1, %p1085_p8 }
  0x4a   : > { %1095 = shalt.err (!%p1092_p2)
}
  0x4b   : > { %s1208_s10 = smov [#allocation6]   ;;  %s1096_s11 = scalar_lea.vmem %s1325_s19, 16 }
  0x4c   : > { %977 = dma.vmem_to_smem (!%p1316_p12), %s1320_s15, 16, %s1208_s10, [#allocation5]  }
  0x4d   : > { %p1097_p3 = scmp.ne.s32.totalorder %s1325_s19, %s1096_s11  ;;  %p1104_p9 = scmp.lt.s32.totalorder %s1325_s19, %s1325_s19 }
  0x4e   : > { %p1105_p6 = scmp.lt.s32.totalorder %s1096_s11, %s1096_s11 }
  0x4f   : > { %p1099_p4 = pnand %p1097_p3, %p1329_p0 }
  0x50   : > { %p1106_p11 = por %p1105_p6, %p1104_p9 }
  0x51   : > { %p1100_p7 = pneg %p1099_p4 }
  0x53   : > { %p1107_p8 = pnand %p1106_p11, %p1100_p7 }
  0x55   : > { %1110 = shalt.err (!%p1107_p8)
}
  0x56   : > { %s1209_s13 = smov [#allocation9]   ;;  %s1816_s4 = sld [smem:[#allocation43_spill]] }
  0x57   : > { %983 = dma.vmem_to_smem (!%p1316_p12), %s1325_s19, 16, %s1209_s13, [#allocation8]  }
  0x5c   : > { %s240_s15 = sshll.u32 %s1816_s4, 4  ;;  %s241_s15 = int_to_ptr.vmem [resolvable:$true] %s240_s15 }
  0x5d   : > { %s1111_s18 = scalar_lea.vmem %s241_s15, 16  ;;  %p1119_p3 = scmp.lt.s32.totalorder %s241_s15, %s241_s15 }
  0x5e   : > { %p1112_p13 = scmp.ne.s32.totalorder %s241_s15, %s1111_s18  ;;  %p1120_p6 = scmp.lt.s32.totalorder %s1111_s18, %s1111_s18 }
  0x60   : > { %p1114_p1 = pnand %p1112_p13, %p1329_p0  ;;  %p1121_p9 = por %p1120_p6, %p1119_p3 }
  0x62   : > { %p1115_p2 = pneg %p1114_p1 }
  0x64   : > { %p1122_p4 = pnand %p1121_p9, %p1115_p2 }
  0x66   : > { %1125 = shalt.err (!%p1122_p4)
}
  0x67   : > { %s1210_s20 = smov [#allocation10]   ;;  %261 = sbr.rel (%p1302_p10) target bundleno = 313 (0x139), region = 44 }
  0x68   : > { %986 = dma.vmem_to_smem (!%p1316_p12), %s241_s15, 16, %s1210_s20, [#allocation11]  }
  0x6e   : > { %p1817_p7 = scmp.eq.s32.totalorder %s1274_s25, 0 }
  0x70   : > { %1171 = dma.done.wait (%p1817_p7), [#allocation4], 16   ;;  %p1818_p11 = pmov %p1817_p7 }
  0x71   : > { %p1819_p0 = pmov %p1817_p7 }
  0x72   : > { %1173 = vsyncadd (%p1818_p11), [#allocation4], 4294967280 }
  0x73   : > { %1175 = dma.done.wait (%p1819_p0), [#allocation5], 16   ;;  %p1820_p8 = pmov %p1819_p0 }
  0x74   : > { %p1821_p13 = pmov %p1819_p0 }
  0x75   : > { %1177 = vsyncadd (%p1820_p8), [#allocation5], 4294967280 }
  0x76   : > { %1179 = dma.done.wait (%p1821_p13), [#allocation8], 32   ;;  %p1822_p12 = pmov %p1819_p0 }
  0x77   : > { %p1823_p10 = pmov %p1819_p0 }
  0x78   : > { %1181 = vsyncadd (%p1822_p12), [#allocation8], 4294967264 }
  0x79   : > { %1183 = dma.done.wait (%p1823_p10), [#allocation11], 16   ;;  %p1824_p1 = pmov %p1819_p0 }
  0x7b   : > { %1185 = vsyncadd (%p1824_p1), [#allocation11], 4294967280 }
  0x7c   : > { %283 = sfence }
  0x7d   : > { %s872_s9 = sshll.u32 %s1274_s25, 2  ;;  %s313_s16 = sld [smem:[#allocation2]]  ;;  %v1211_v23 = vmov 683565275   ;;  %v1212_v25 = vmov 2475754826  }
  0x7e   : > { %p308_p2 = scmp.lt.s32.totalorder %s872_s9, 7  ;;  %s1825_s5 = sld [smem:[#allocation44_spill]]  ;;  %v1213_v27 = vmov 2131351028   ;;  %v1214_v29 = vmov 2102212464  }
  0x7f   : > { %v1215_v31 = vmov 920167782   ;;  %v1216_v38 = vmov 1326507024   ;;  %s1478_s28 = sld [smem:[#allocation6]]  ;;  %s1484_s10 = sld [smem:[#allocation6 + $0x1]] }
  0x80   : > { %s1867_s9 = smov (!%p308_p2, %s872_s9), 7  ;;  %s1480_s29 = sld [smem:[#allocation7]] }
  0x81   : > { %s1486_s11 = sld [smem:[#allocation7 + $0x1]]  ;;  %s1488_s13 = sld [smem:[#allocation6 + $0x2]] }
  0x82   : > { %s1490_s14 = sld [smem:[#allocation7 + $0x2]]  ;;  %s1492_s17 = sld [smem:[#allocation6 + $0x3]] }
  0x83   : > { %v1400_v2 = vstv %s313_s16  ;;  %s1494_s15 = sld [smem:[#allocation7 + $0x3]]  ;;  %s1496_s18 = sld [smem:[#allocation6 + $0x4]] }
  0x84   : > { %s310_s12 = scalar_lea.vmem %s1825_s5, %s1867_s9  ;;  %v315_v3 = vand.u32 2147483647, %v1400_v2  ;;  %v318_v4 = vand.u32 2139095040, %v1400_v2  ;;  %vm317_vm13 = vcmp.lt.s32.totalorder %v1400_v2, 0  ;;  %s1498_s20 = sld [smem:[#allocation7 + $0x4]] }
  0x85   : > { %v420_v0 = vld [vmem:[%s310_s12] sm:$0xf]  ;;  %s1500_s9 = sld [smem:[#allocation6 + $0x5]]  ;;  %s1504_s19 = sld [smem:[#allocation6 + $0x6]] }
  0x86   : > { %v877_v1 = vclamps-f32 %v420_v0, 1.0  ;;  %v319_v6 = vshrl.u32 %v318_v4, 23  ;;  %v322_v7 = vand.u32 8388607, %v315_v3  ;;  %vm316_vm14 = vcmp.le.f32.partialorder %v315_v3, 0.7853982 }
  0x87   : > { %s1502_s16 = sld [smem:[#allocation7 + $0x5]]  ;;  %s1506_s26 = sld [smem:[#allocation7 + $0x6]] }
  0x88   : > { %v1404_v5 = vmul.f32 3.1415927, %v877_v1  ;;  %v873_v10 = vadd.s32 4294967169, %v319_v6  ;;  %v323_v13 = vor.u32 8388608, %v322_v7  ;;  %s1508_s12 = sld [smem:[#allocation6 + $0x7]]  ;;  %s1512_s1 = sld [smem:[#allocation10]] }
  0x89   : > { %1828 = sst [smem:[#allocation27_spill]] %s1494_s15  ;;  %s1510_s0 = sld [smem:[#allocation7 + $0x7]] }
  0x8a   : > { %v424_v8 = vand.u32 2147483647, %v1404_v5  ;;  %v427_v9 = vand.u32 2139095040, %v1404_v5  ;;  %v325_v12 = vadd.s32 1, %v873_v10  ;;  %v1414_v20 = vshll.u32 %v323_v13, 8  ;;  %s1514_s2 = sld [smem:[#allocation9]] }
  0x8b   : > { %s1516_s3 = sld [smem:[#allocation9 + $0x1]]  ;;  %s1518_s4 = sld [smem:[#allocation9 + $0x2]] }
  0x8c   : > { %v428_v11 = vshrl.u32 %v427_v9, 23  ;;  %v1412_v15 = vand.u32 8388607, %v424_v8  ;;  %vm326_vm0 = vcmp.gt.s32.totalorder %v325_v12, 0  ;;  %s1520_s5 = sld [smem:[#allocation9 + $0x3]]  ;;  %s1522_s30 = sld [smem:[#allocation9 + $0x4]] }
  0x8d   : > { %v327_v16 = vsel %vm326_vm0, %v325_v12, 0  ;;  %1829 = sst [smem:[#allocation28_spill]] %s1502_s16  ;;  %s1524_s23 = sld [smem:[#allocation9 + $0x5]] }
  0x8e   : > { %v878_v14 = vadd.s32 4294967169, %v428_v11  ;;  %v328_v18 = vshrl.u32 %v327_v16, 5  ;;  %v329_v19 = vand.u32 31, %v327_v16  ;;  %v432_v21 = vor.u32 8388608, %v1412_v15  ;;  %1830 = sst [smem:[#allocation29_spill]] %s1506_s26  ;;  %s1526_s27 = sld [smem:[#allocation9 + $0x6]] }
  0x8f   : > { %1831 = sst [smem:[#allocation30_spill]] %s1508_s12  ;;  %s1528_s8 = sld [smem:[#allocation9 + $0x7]] }
  0x90   : > { %v434_v17 = vadd.s32 1, %v878_v14  ;;  %v330_v22 = vsub.s32 32, %v329_v19  ;;  %v332_v24 = vshll.u32 %v1211_v23, %v329_v19  ;;  %v335_v26 = vshll.u32 %v1212_v25, %v329_v19  ;;  %1832 = sst [smem:[#allocation31_spill]] %s1510_s0  ;;  %s1530_s21 = sld [smem:[#allocation10 + $0x1]] }
  0x91   : > { %v338_v28 = vshll.u32 %v1213_v27, %v329_v19  ;;  %v341_v30 = vshll.u32 %v1214_v29, %v329_v19  ;;  %v344_v32 = vshll.u32 %v1215_v31, %v329_v19  ;;  %vm347_vm2 = vcmp.lt.s32.totalorder %v328_v18, 1  ;;  %s1532_s24 = sld [smem:[#allocation9 + $0x8]]  ;;  %s1534_s6 = sld [smem:[#allocation9 + $0x9]] }
  0x92   : > { %vm435_vm1 = vcmp.gt.s32.totalorder %v434_v17, 0  ;;  %vm348_vm3 = vcmp.lt.s32.totalorder %v328_v18, 2  ;;  %v331_v33 = vshrl.u32 %v1211_v23, %v330_v22  ;;  %v333_v34 = vshrl.u32 %v1212_v25, %v330_v22  ;;  %1833 = sst [smem:[#allocation32_spill]] %s1522_s30  ;;  %s1537_s7 = sld [smem:[#allocation9 + $0xa]] }
  0x93   : > { %v336_v35 = vshrl.u32 %v1213_v27, %v330_v22  ;;  %v339_v36 = vshrl.u32 %v1214_v29, %v330_v22  ;;  %v342_v37 = vshrl.u32 %v1215_v31, %v330_v22  ;;  %v345_v39 = vshrl.u32 %v1216_v38, %v330_v22  ;;  %1834 = sst [smem:[#allocation33_spill]] %s1524_s23  ;;  %s1539_s25 = sld [smem:[#allocation9 + $0xb]] }
  0x94   : > { %vm349_vm4 = vcmp.lt.s32.totalorder %v328_v18, 3  ;;  %vm350_vm5 = vcmp.lt.s32.totalorder %v328_v18, 4  ;;  %v334_v40 = vor.u32 %v333_v34, %v332_v24  ;;  %v436_v43 = vsel %vm435_vm1, %v434_v17, 0  ;;  %s1542_s22 = sld [smem:[#allocation9 + $0xc]] }
  0x95   : > { %v337_v41 = vor.u32 %v336_v35, %v335_v26  ;;  %v340_v42 = vor.u32 %v339_v36, %v338_v28  ;;  %v343_v44 = vor.u32 %v342_v37, %v341_v30  ;;  %v346_v45 = vor.u32 %v345_v39, %v344_v32  ;;  %1835 = sst [smem:[#allocation34_spill]] %s1528_s8 }
  0x96   : > { %v437_v46 = vshrl.u32 %v436_v43, 5  ;;  %v438_v47 = vand.u32 31, %v436_v43  ;;  %v351_v48 = vsel %vm347_vm2, %v331_v33, %v334_v40  ;;  %1836 = sst [smem:[#allocation35_spill]] %s1530_s21  ;;  %s1544_s21 = sld [smem:[#allocation9 + $0xd]] }
  0x97   : > { %v352_v49 = vsel %vm350_vm5, %v340_v42, 2102212464  ;;  %v355_v50 = vsel %vm347_vm2, %v334_v40, %v337_v41  ;;  %v359_v51 = vsel %vm347_vm2, %v337_v41, %v340_v42  ;;  %v356_v53 = vsel %vm350_vm5, %v343_v44, 920167782 }
  0x98   : > { %v353_v52 = vsel %vm349_vm4, %v337_v41, %v352_v49  ;;  %v360_v54 = vsel %vm350_vm5, %v346_v45, 1326507024  ;;  %v439_v55 = vsub.s32 32, %v438_v47  ;;  %v357_v57 = vsel %vm349_vm4, %v340_v42, %v356_v53  ;;  %1837 = sst [smem:[#allocation36_spill]] %s1537_s7  ;;  %s1552_s7 = sld [smem:[#allocation9 + $0xf]] }
  0x99   : > { %v354_v56 = vsel %vm348_vm3, %v351_v48, %v353_v52  ;;  %v361_v58 = vsel %vm349_vm4, %v343_v44, %v360_v54  ;;  %v441_v59 = vshll.u32 %v1211_v23, %v438_v47  ;;  %v358_v60 = vsel %vm348_vm3, %v355_v50, %v357_v57  ;;  %1838 = sst [smem:[#allocation37_spill]] %s1539_s25  ;;  %s1550_s25 = sld [smem:[#allocation9 + $0xe]] }
  0x9a   : > { %v362_v61 = vsel %vm348_vm3, %v359_v51, %v361_v58  ;;  %v370_v62 = vmul.u32 %v1414_v20, %v354_v56  ;;  %v440_v63 = vshrl.u32 %v1211_v23, %v439_v55  ;;  %v442_v7 = vshrl.u32 %v1212_v25, %v439_v55 }
  0x9b   : > { %v1429_v0 = vmul.u32.u64.low %v1414_v20, %v362_v61  ;;  %v1430_v1 = vmul.u32.u64.high %v1414_v20, %v362_v61, %v1429_v0  ;;  %v1433_v4 = vmul.u32.u64.low %v1414_v20, %v358_v60  ;;  %v1434_v6 = vmul.u32.u64.high %v1414_v20, %v358_v60, %v1433_v4 }
  0x9c   : > { %v444_v9 = vshll.u32 %v1212_v25, %v438_v47  ;;  %v445_v10 = vshrl.u32 %v1213_v27, %v439_v55  ;;  %v447_v11 = vshll.u32 %v1213_v27, %v438_v47  ;;  %v448_v12 = vshrl.u32 %v1214_v29, %v439_v55 }
  0x9d   : > { %v450_v13 = vshll.u32 %v1214_v29, %v438_v47  ;;  %v451_v14 = vshrl.u32 %v1215_v31, %v439_v55  ;;  %v453_v16 = vshll.u32 %v1215_v31, %v438_v47  ;;  %v443_v17 = vor.u32 %v442_v7, %v441_v59 }
  0x9e   : > { %v446_v18 = vor.u32 %v445_v10, %v444_v9  ;;  %v454_v19 = vshrl.u32 %v1216_v38, %v439_v55  ;;  %vm456_vm6 = vcmp.lt.s32.totalorder %v437_v46, 1  ;;  %vm372_vm7 = vc.u32 %v1430_v1, %v1433_v4  ;;  %1839 = sst [smem:[#allocation38_spill]] %s1552_s7 }
  0x9f   : > { %v373_v22 = vadd.s32 1, %v1434_v6  ;;  %v449_v23 = vor.u32 %v448_v12, %v447_v11  ;;  %v472_v20 = vshll.u32 %v432_v21, 8  ;;  %v452_v24 = vor.u32 %v451_v14, %v450_v13 }
  0xa0   : > { %v455_v25 = vor.u32 %v454_v19, %v453_v16  ;;  %vm457_vm8 = vcmp.lt.s32.totalorder %v437_v46, 2  ;;  %vm458_vm9 = vcmp.lt.s32.totalorder %v437_v46, 3  ;;  %vm459_vm10 = vcmp.lt.s32.totalorder %v437_v46, 4 }
  0xa1   : > { %v374_v26 = vsel %vm372_vm7, %v373_v22, %v1434_v6  ;;  %v460_v27 = vsel %vm456_vm6, %v440_v63, %v443_v17  ;;  %v464_v28 = vsel %vm456_vm6, %v443_v17, %v446_v18  ;;  %v461_v30 = vsel %vm459_vm10, %v449_v23, 2102212464 }
  0xa2   : > { %v375_v29 = vadd.s32 %v374_v26, %v370_v62  ;;  %v465_v31 = vsel %vm459_vm10, %v452_v24, 920167782  ;;  %v468_v32 = vsel %vm456_vm6, %v446_v18, %v449_v23  ;;  %v462_v33 = vsel %vm458_vm9, %v446_v18, %v461_v30 }
  0xa3   : > { %v466_v34 = vsel %vm458_vm9, %v449_v23, %v465_v31  ;;  %v469_v15 = vsel %vm459_vm10, %v455_v25, 1326507024  ;;  %v463_v37 = vsel %vm457_vm8, %v460_v27, %v462_v33  ;;  %v371_v57 = vadd.s32 %v1433_v4, %v1430_v1 }
  0xa4   : > { %v376_v21 = vadd.s32 536870912, %v375_v29  ;;  %v467_v35 = vsel %vm457_vm8, %v464_v28, %v466_v34  ;;  %v470_v36 = vsel %vm458_vm9, %v452_v24, %v469_v15  ;;  %v479_v45 = vmul.u32 %v472_v20, %v463_v37 }
  0xa5   : > { %v471_v38 = vsel %vm457_vm8, %v468_v32, %v470_v36  ;;  %v1447_v39 = vmul.u32.u64.low %v472_v20, %v467_v35  ;;  %v1448_v40 = vmul.u32.u64.high %v472_v20, %v467_v35, %v1447_v39  ;;  %vm407_vm2 = vweird.f32 %v1400_v2 }
  0xa6   : > { %v377_v41 = vshrl.u32 %v376_v21, 30  ;;  %v1450_v42 = vmul.u32.u64.low %v472_v20, %v471_v38  ;;  %v1451_v43 = vmul.u32.u64.high %v472_v20, %v471_v38, %v1450_v42  ;;  %vm426_vm4 = vcmp.lt.s32.totalorder %v1404_v5, 0 }
  0xa7   : > { %v482_v47 = vadd.s32 1, %v1448_v40  ;;  %vm1469_vm5 = vcmp.le.f32.partialorder %v424_v8, 0.7853982  ;;  %vm516_vm8 = vweird.f32 %v1404_v5 }
  0xa8   : > { %v378_v44 = vshll.u32 %v377_v41, 30  ;;  %vm481_vm11 = vc.u32 %v1451_v43, %v1447_v39  ;;  %v401_v4 = vsub.s32 4, %v377_v41  ;;  %v480_v30 = vadd.s32 %v1447_v39, %v1451_v43 }
  0xa9   : > { %v483_v49 = vsel %vm481_vm11, %v482_v47, %v1448_v40 }
  0xaa   : > { %v379_v48 = vsub.s32 %v375_v29, %v378_v44  ;;  %v484_v51 = vadd.s32 %v483_v49, %v479_v45  ;;  %v402_v22 = vsel %vm317_vm13, %v401_v4, %v377_v41  ;;  %v597_v4 = vstv %s1518_s4  ;;  %s1671_s4 = sld [smem:[#allocation9 + $0x1e]] }
  0xab   : > { %v404_v23 = vsel %vm316_vm14, 0, %v402_v22  ;;  %v609_v22 = vstv %s1524_s23  ;;  %s1599_s23 = sld [smem:[#allocation10 + $0x3]] }
  0xac   : > { %v381_v50 = vsub.s32 0, %v379_v48  ;;  %v485_v52 = vadd.s32 536870912, %v484_v51  ;;  %v408_v20 = vand.u32 3, %v404_v23  ;;  %v613_v23 = vstv %s1526_s27 }
  0xae   : > { %v874_v46 = vmin.u32 %v381_v50, %v379_v48  ;;  %v1456_v54 = vshrl.u32 %v485_v52, 30  ;;  %vm413_vm0 = vcmp.eq.s32.totalorder %v408_v20, 2  ;;  %vm410_vm1 = vcmp.eq.s32.totalorder %v408_v20, 0 }
  0xaf   : > { %vm409_vm3 = vcmp.lt.s32.totalorder %v408_v20, 2  ;;  %v617_v20 = vstv %s1528_s8  ;;  %s1608_s8 = sld [smem:[#allocation9 + $0x1a]] }
  0xb0   : > { %v383_v53 = vclz %v874_v46  ;;  %v487_v56 = vshll.u32 %v1456_v54, 30  ;;  %v510_v44 = vsub.s32 4, %v1456_v54 }
  0xb2   : > { %v875_v55 = vadd.s32 4294967294, %v383_v53  ;;  %v488_v59 = vsub.s32 %v484_v51, %v487_v56  ;;  %v511_v47 = vsel %vm426_vm4, %v510_v44, %v1456_v54  ;;  %v534_v56 = vstv %s1480_s29 }
  0xb3   : > { %v513_v8 = vsel %vm1469_vm5, 0, %v511_v47 }
  0xb4   : > { %vm876_vm12 = vcmp.lt.s32.totalorder %v875_v55, 0  ;;  %v490_v6 = vsub.s32 0, %v488_v59 }
  0xb5   : > { %v386_v58 = vsel %vm876_vm12, 0, %v875_v55  ;;  %v531_v55 = vstv %s1478_s28  ;;  %s1558_s28 = sld [smem:[#allocation10 + $0x2]] }
  0xb6   : > { %v387_v60 = vsub.s32 32, %v386_v58  ;;  %v388_v61 = vshll.u32 %v379_v48, %v386_v58  ;;  %v391_v62 = vsub.s32 4294967266, %v386_v58  ;;  %v879_v12 = vmin.u32 %v490_v6, %v488_v59 }
  0xb7   : > { %v517_v48 = vadd.s32 3, %v513_v8  ;;  %v541_v58 = vstv %s1486_s11  ;;  %v562_v6 = vstv %s1498_s20 }
  0xb8   : > { %v389_v63 = vshrl.u32 %v371_v57, %v387_v60  ;;  %v392_v0 = vadd.s32 127, %v391_v62  ;;  %v492_v16 = vclz %v879_v12  ;;  %v538_v57 = vstv %s1484_s10  ;;  %s1560_s10 = sld [smem:[#allocation9 + $0x10]] }
  0xb9   : > { %v518_v51 = vand.u32 3, %v517_v48  ;;  %v548_v60 = vstv %s1490_s14  ;;  %v555_v62 = vstv %s1494_s15  ;;  %v580_v12 = vstv %s1508_s12  ;;  %s1587_s12 = sld [smem:[#allocation9 + $0x15]] }
  0xba   : > { %v390_v7 = vor.u32 %v389_v63, %v388_v61  ;;  %v393_v9 = vshll.u32 %v392_v0, 23  ;;  %v880_v19 = vadd.s32 4294967294, %v492_v16  ;;  %v552_v61 = vstv %s1492_s17  ;;  %s1572_s17 = sld [smem:[#allocation9 + $0x12]] }
  0xbb   : > { %vm520_vm6 = vcmp.eq.s32.totalorder %v518_v51, 0  ;;  %vm523_vm7 = vcmp.eq.s32.totalorder %v518_v51, 2  ;;  %vm519_vm9 = vcmp.lt.s32.totalorder %v518_v51, 2  ;;  %v559_v63 = vstv %s1496_s18  ;;  %s1574_s18 = sld [smem:[#allocation9 + $0x13]] }
  0xbc   : > { %v394_v10 = vor.u32 4788187, %v393_v9  ;;  %v397_v11 = vcvt.s32.f32 %v390_v7  ;;  %vm881_vm15 = vcmp.lt.s32.totalorder %v880_v19, 0  ;;  %v566_v7 = vstv %s1500_s9  ;;  %s1840_s9 = sld [smem:[#allocation35_spill]] }
  0xbd   : > { %v495_v24 = vsel %vm881_vm15, 0, %v880_v19  ;;  %v569_v9 = vstv %s1502_s16  ;;  %v590_v16 = vstv %s1512_s1  ;;  %s1580_s16 = sld [smem:[#allocation9 + $0x14]]  ;;  %v605_v19 = vstv %s1522_s30  ;;  %s1601_s30 = sld [smem:[#allocation9 + $0x18]] }
  0xbe   : > { %v395_v13 = vand.u32 2147483647, %v394_v10  ;;  %v500_v25 = vsub.s32 4294967266, %v495_v24  ;;  %v496_v31 = vsub.s32 32, %v495_v24  ;;  %v497_v21 = vshll.u32 %v488_v59, %v495_v24  ;;  %s1849_s1 = sld [smem:[#allocation19_spill]] }
  0xbf   : > { %v545_v59 = vstv %s1488_s13  ;;  %s1566_s13 = sld [smem:[#allocation9 + $0x11]]  ;;  %v573_v10 = vstv %s1504_s19  ;;  %s1841_s19 = sld [smem:[#allocation36_spill]]  ;;  %v620_v24 = vlaneseq  ;;  %v684_v48 = vstv %s1587_s12 }
  0xc0   : > { %v398_v14 = vmul.f32 %v397_v11, %v395_v13  ;;  %v501_v32 = vadd.s32 127, %v500_v25  ;;  %v498_v35 = vshrl.u32 %v480_v30, %v496_v31  ;;  %v576_v11 = vstv %s1506_s26 }
  0xc1   : > { %v583_v13 = vstv %s1510_s0  ;;  %s1842_s0 = sld [smem:[#allocation37_spill]]  ;;  %v627_v25 = vstv %s1532_s24  ;;  %v644_v30 = vstv %s1542_s22  ;;  %v648_v31 = vstv %s1544_s21  ;;  %s1606_s24 = sld [smem:[#allocation9 + $0x19]] }
  0xc2   : > { %v399_v1 = vxor.u32 2147483648, %v398_v14  ;;  %v502_v36 = vshll.u32 %v501_v32, 23  ;;  %v499_v37 = vor.u32 %v498_v35, %v497_v21  ;;  %v652_v32 = vstv %s1550_s25  ;;  %s1855_s21 = sld [smem:[#allocation22_spill]] }
  0xc3   : > { %v680_v44 = vstv %s1580_s16  ;;  %vm1665_vm10 = vcmp.lt.s32.totalorder %v620_v24, 512  ;;  %s1857_s16 = sld [smem:[#allocation45_spill]] }
  0xc4   : > { %v400_v17 = vsel %vm317_vm13, %v399_v1, %v398_v14  ;;  %v503_v38 = vor.u32 4788187, %v502_v36  ;;  %v506_v41 = vcvt.s32.f32 %v499_v37  ;;  %v588_v14 = vstv %s1514_s2  ;;  %s1592_s2 = sld [smem:[#allocation9 + $0x16]] }
  0xc5   : > { %v403_v18 = vsel %vm316_vm14, %v1400_v2, %v400_v17  ;;  %v593_v1 = vstv %s1516_s3 }
  0xc6   : > { %1045 = vcosq.f32 %v403_v18  ;;  %v504_v40 = vand.u32 2147483647, %v503_v38 }
  0xc7   : > { %1047 = vsinq.f32 %v403_v18  ;;  %v601_v18 = vstv %s1520_s5  ;;  %s304_s5 = sand.u32 1, %s1849_s1  }
  0xc8   : > { %v507_v42 = vmul.f32 %v506_v41, %v504_v40  ;;  %v668_v40 = vstv %s1566_s13  ;;  %v672_v41 = vstv %s1572_s17  ;;  %s871_s22 = sshll.u32 %s304_s5, 4  ;;  %s734_s17 = scalar_lea.sflag [#allocation3], %s304_s5 }
  0xc9   : > { %s306_s25 = scalar_lea.vmem [#allocation12], %s871_s22 }
  0xca   : > { %v508_v2 = vxor.u32 2147483648, %v507_v42  ;;  %v688_v51 = vstv %s1592_s2  ;;  %s748_s11 = sshll.u32 %s306_s25, 4  ;;  %s1716_s11 = int_to_ptr.vmem [resolvable:$true] %s748_s11 }
  0xcc   : > { %v509_v43 = vsel %vm426_vm4, %v508_v2, %v507_v42  ;;  %v676_v42 = vstv %s1574_s18  ;;  %s1126_s18 = scalar_lea.vmem %s1716_s11, 256 }
  0xcd   : > { %v512_v45 = vsel %vm1469_vm5, %v1404_v5, %v509_v43  ;;  %p1127_p3 = scmp.ne.s32.totalorder %s1716_s11, %s1126_s18 }
  0xce   : > { %1049 = vcosq.f32 %v512_v45 }
  0xcf   : > { %1051 = vsinq.f32 %v512_v45  ;;  %p1128_p6 = pnand %p1127_p3, %p1291_p5 }
  0xd0   : > { %v1046_v26 = vpop.eup %1045 }
  0xd1   : > { %v1048_v27 = vpop.eup %1047  ;;  %v414_v28 = vxor.u32 2147483648, %v1046_v26  ;;  %p1129_p9 = pneg %p1128_p6 }
  0xd2   : > { %v411_v3 = vxor.u32 2147483648, %v1048_v27 }
  0xd3   : > { %v415_v29 = vsel %vm413_vm0, %v414_v28, %v1048_v27  ;;  %v632_v27 = vstv %s1534_s6  ;;  %v636_v28 = vstv %s1841_s19  ;;  %s1217_s19 = smov [#allocation12]  }
  0xd4   : > { %v412_v33 = vsel %vm410_vm1, %v1046_v26, %v411_v3  ;;  %v629_v26 = vstv %s1840_s9  ;;  %s1616_s9 = sld [smem:[#allocation9 + $0x1c]]  ;;  %s1130_s2 = sshll.u32 %s1217_s19, 4  ;;  %s1131_s2 = int_to_ptr.vmem [resolvable:$false] %s1130_s2 }
  0xd5   : > { %v416_v34 = vsel %vm409_vm3, %v412_v33, %v415_v29  ;;  %v640_v29 = vstv %s1842_s0  ;;  %v656_v33 = vstv %s1552_s7  ;;  %s1621_s7 = sld [smem:[#allocation9 + $0x1d]]  ;;  %p1133_p4 = scmp.lt.s32.totalorder %s1716_s11, %s1131_s2 }
  0xd6   : > { %v417_v15 = vsel %vm407_vm2, nan, %v416_v34  ;;  %v663_v34 = vstv %s1560_s10 }
  0xd7   : > { %943 = vpush %v417_v15  ;;  %v665_v15 = vstv %s1558_s28 }
  0xd8   : > { %v1050_v49 = vpop.eup %1049 }
  0xd9   : > { %v1052_v50 = vpop.eup %1051  ;;  %v524_v52 = vxor.u32 2147483648, %v1050_v49 }
  0xda   : > { %v521_v46 = vxor.u32 2147483648, %v1052_v50 }
  0xdb   : > { %v525_v54 = vsel %vm523_vm7, %v524_v52, %v1052_v50 }
  0xdc   : > { %v522_v53 = vsel %vm520_vm6, %v1050_v49, %v521_v46 }
  0xdd   : > { %v526_v0 = vsel %vm519_vm9, %v522_v53, %v525_v54 }
  0xde   : > { %v527_v17 = vsel %vm516_vm8, nan, %v526_v0 }
 0x108   : > { %s944_s15 = spop %943 }
 0x109   : > { %s419_s26 = ssub.f32 0.0, %s944_s15  ;;  %s1594_s15 = sld [smem:[#allocation9 + $0x17]] }
 0x10b   : > { %v528_v5 = vstv %s419_s26  ;;  %s1614_s26 = sld [smem:[#allocation9 + $0x1b]] }
 0x10c   : > { %v529_v3 = vmul.f32 %v528_v5, %v527_v17  ;;  %v720_v5 = vstv %s1621_s7 }
 0x10e   : > { %v532_v21 = vmul.f32 %v531_v55, %v529_v3  ;;  %v539_v35 = vmul.f32 %v538_v57, %v529_v3  ;;  %v546_v36 = vmul.f32 %v545_v59, %v529_v3  ;;  %v553_v37 = vmul.f32 %v552_v61, %v529_v3 }
 0x10f   : > { %v560_v38 = vmul.f32 %v559_v63, %v529_v3  ;;  %v567_v47 = vmul.f32 %v566_v7, %v529_v3  ;;  %v574_v8 = vmul.f32 %v573_v10, %v529_v3  ;;  %v692_v46 = vstv %s1594_s15  ;;  %s1132_s15 = scalar_lea.vmem %s1131_s2, 512 }
 0x110   : > { %v535_v2 = vadd.f32 %v534_v56, %v532_v21  ;;  %v542_v39 = vadd.f32 %v541_v58, %v539_v35  ;;  %v549_v43 = vadd.f32 %v548_v60, %v546_v36  ;;  %v556_v45 = vadd.f32 %v555_v62, %v553_v37  ;;  %p1134_p7 = scmp.lt.s32.totalorder %s1132_s15, %s1126_s18 }
 0x111   : > { %v563_v53 = vadd.f32 %v562_v6, %v560_v38  ;;  %v581_v54 = vmul.f32 %v580_v12, %v529_v3  ;;  %v699_v55 = vstv %s1601_s30  ;;  %v701_v57 = vstv %s1599_s23  ;;  %s1680_s30 = sld [smem:[#allocation9 + $0x1f]] }
 0x112   : > { %v536_v49 = vmax.f32 %v535_v2, 0.0  ;;  %v543_v50 = vmax.f32 %v542_v39, 0.0  ;;  %v550_v52 = vmax.f32 %v549_v43, 0.0  ;;  %v704_v58 = vstv %s1606_s24  ;;  %p1135_p11 = por %p1134_p7, %p1133_p4 }
 0x113   : > { %v708_v59 = vstv %s1608_s8  ;;  %v557_v60 = vmax.f32 %v556_v45, 0.0  ;;  %v570_v61 = vadd.f32 %v569_v9, %v567_v47  ;;  %v577_v62 = vadd.f32 %v576_v11, %v574_v8  ;;  %s938_s8 = sshll.u32 %s1855_s21, 8 }
 0x114   : > { %v589_v56 = vmul.f32 %v588_v14, %v536_v49  ;;  %v712_v63 = vstv %s1614_s26  ;;  %v594_v6 = vmul.f32 %v593_v1, %v543_v50  ;;  %v628_v7 = vmul.f32 %v627_v25, %v536_v49  ;;  %s1714_s12 = scalar_lea.hbm %s1857_s16, %s938_s8  ;;  %p1136_p0 = pnand %p1135_p11, %p1129_p9 }
 0x115   : > { %v716_v10 = vstv %s1616_s9  ;;  %v564_v12 = vmax.f32 %v563_v53, 0.0  ;;  %v584_v14 = vadd.f32 %v583_v13, %v581_v54  ;;  %v598_v17 = vmul.f32 %v597_v4, %v550_v52 }
 0x116   : > { %v591_v0 = vadd.f32 %v590_v16, %v589_v56  ;;  %v630_v3 = vadd.f32 %v629_v26, %v628_v7  ;;  %v633_v11 = vmul.f32 %v632_v27, %v543_v50  ;;  %v664_v21 = vmul.f32 %v663_v34, %v536_v49 }
 0x117   : > { %v571_v35 = vmax.f32 %v570_v61, 0.0  ;;  %v578_v36 = vmax.f32 %v577_v62, 0.0  ;;  %v602_v16 = vmul.f32 %v601_v18, %v557_v60  ;;  %v637_v1 = vmul.f32 %v636_v28, %v550_v52 }
 0x118   : > { %v595_v9 = vadd.f32 %v594_v6, %v591_v0  ;;  %v634_v13 = vadd.f32 %v633_v11, %v630_v3  ;;  %v666_v37 = vadd.f32 %v665_v15, %v664_v21  ;;  %v669_v38 = vmul.f32 %v668_v40, %v543_v50 }
 0x119   : > { %v585_v4 = vmax.f32 %v584_v14, 0.0  ;;  %v606_v2 = vmul.f32 %v605_v19, %v564_v12  ;;  %v641_v18 = vmul.f32 %v640_v29, %v557_v60  ;;  %v700_v27 = vmul.f32 %v699_v55, %v536_v49 }
 0x11a   : > { %v599_v25 = vadd.f32 %v598_v17, %v595_v9  ;;  %v638_v34 = vadd.f32 %v637_v1, %v634_v13  ;;  %v670_v15 = vadd.f32 %v669_v38, %v666_v37  ;;  %v673_v40 = vmul.f32 %v672_v41, %v550_v52 }
 0x11b   : > { %v610_v19 = vmul.f32 %v609_v22, %v571_v35  ;;  %v645_v24 = vmul.f32 %v644_v30, %v564_v12  ;;  %v702_v39 = vadd.f32 %v701_v57, %v700_v27  ;;  %v705_v43 = vmul.f32 %v704_v58, %v543_v50 }
 0x11c   : > { %v603_v28 = vadd.f32 %v602_v16, %v599_v25  ;;  %v642_v45 = vadd.f32 %v641_v18, %v638_v34  ;;  %v674_v47 = vadd.f32 %v673_v40, %v670_v15  ;;  %v677_v8 = vmul.f32 %v676_v42, %v557_v60 }
 0x11d   : > { %v614_v49 = vmul.f32 %v613_v23, %v578_v36  ;;  %v649_v41 = vmul.f32 %v648_v31, %v571_v35  ;;  %v706_v22 = vadd.f32 %v705_v43, %v702_v39  ;;  %v709_v30 = vmul.f32 %v708_v59, %v550_v52 }
 0x11e   : > { %v607_v29 = vadd.f32 %v606_v2, %v603_v28  ;;  %v646_v53 = vadd.f32 %v645_v24, %v642_v45  ;;  %v678_v54 = vadd.f32 %v677_v8, %v674_v47  ;;  %v681_v55 = vmul.f32 %v680_v44, %v564_v12 }
 0x11f   : > { %v618_v42 = vmul.f32 %v617_v20, %v585_v4  ;;  %v653_v56 = vmul.f32 %v652_v32, %v578_v36  ;;  %v710_v23 = vadd.f32 %v709_v30, %v706_v22  ;;  %v713_v57 = vmul.f32 %v712_v63, %v557_v60 }
 0x120   : > { %v611_v50 = vadd.f32 %v610_v19, %v607_v29  ;;  %v650_v31 = vadd.f32 %v649_v41, %v646_v53  ;;  %v682_v61 = vadd.f32 %v681_v55, %v678_v54  ;;  %v685_v52 = vmul.f32 %v684_v48, %v571_v35 }
 0x121   : > { %v657_v59 = vmul.f32 %v656_v33, %v585_v4  ;;  %v714_v62 = vadd.f32 %v713_v57, %v710_v23  ;;  %v717_v0 = vmul.f32 %v716_v10, %v564_v12  ;;  %v724_v6 = vstv %s1671_s4 }
 0x122   : > { %v615_v58 = vadd.f32 %v614_v49, %v611_v50  ;;  %v654_v7 = vadd.f32 %v653_v56, %v650_v31  ;;  %v686_v20 = vadd.f32 %v685_v52, %v682_v61  ;;  %v689_v32 = vmul.f32 %v688_v51, %v578_v36 }
 0x123   : > { %v718_v14 = vadd.f32 %v717_v0, %v714_v62  ;;  %v721_v60 = vmul.f32 %v720_v5, %v571_v35  ;;  %v693_v33 = vmul.f32 %v692_v46, %v585_v4  ;;  %v728_v17 = vstv %s1680_s30 }
 0x124   : > { %v619_v44 = vadd.f32 %v618_v42, %v615_v58  ;;  %v658_v63 = vadd.f32 %v657_v59, %v654_v7  ;;  %v690_v48 = vadd.f32 %v689_v32, %v686_v20  ;;  %v725_v12 = vmul.f32 %v724_v6, %v578_v36 }
 0x125   : > { %v722_v10 = vadd.f32 %v721_v60, %v718_v14  ;;  %v729_v5 = vmul.f32 %v728_v17, %v585_v4 }
 0x126   : > { %624 = vst.msk [vmem:[%s306_s25] ss:$4 sm:$0xf] %vm1665_vm10, %v619_v44  ;;  %912 = vst.msk [vmem:[%s306_s25 + $0x1] ss:$4 sm:$0xf] %vm1665_vm10, %v658_v63  ;;  %v694_v9 = vadd.f32 %v693_v33, %v690_v48 }
 0x127   : > { %v726_v51 = vadd.f32 %v725_v12, %v722_v10 }
 0x128   : > { %922 = vst.msk [vmem:[%s306_s25 + $0x2] ss:$4 sm:$0xf] %vm1665_vm10, %v694_v9 }
 0x129   : > { %v730_v3 = vadd.f32 %v729_v5, %v726_v51 }
 0x12b   : > { %932 = vst.msk [vmem:[%s306_s25 + $0x3] ss:$4 sm:$0xf] %vm1665_vm10, %v730_v3 }
 0x12c   : > { %1139 = shalt.err (!%p1136_p0)
}
 0x12d   : > { %s1140_s24 = scalar_lea.hbm %s1714_s12, 256  ;;  %s1144_s9 = scalar_lea.hbm %s1857_s16, 512 }
 0x12e   : > { %p1141_p8 = scmp.ne.s32.totalorder %s1714_s12, %s1140_s24  ;;  %p1145_p10 = scmp.lt.u32.totalorder %s1714_s12, %s1857_s16 }
 0x12f   : > { %p1146_p1 = scmp.lt.u32.totalorder %s1144_s9, %s1140_s24  ;;  %p1148_p3 = scmp.lt.u32.totalorder %s1140_s24, %s1714_s12 }
 0x130   : > { %p1142_p13 = pnand %p1141_p8, %p1291_p5 }
 0x131   : > { %p1147_p2 = por %p1146_p1, %p1145_p10 }
 0x132   : > { %p1143_p12 = pneg %p1142_p13 }
 0x133   : > { %p1149_p6 = por %p1148_p3, %p1147_p2 }
 0x135   : > { %p1150_p9 = pnand %p1149_p6, %p1143_p12 }
 0x137   : > { %1153 = shalt.err (!%p1150_p9)
}
 0x138   : > { %969 = dma.vmem_to_hbm [thread:$0]  (%p1291_p5), %s1716_s11, 256, %s1714_s12, %s734_s17  }
 0x139 PF: > { %s1858_s13 = sld [smem:[#allocation21_spill]]  ;;  %s1859_s29 = sld [smem:[#allocation18_spill]] }
 0x13a   : > { %s1860_s23 = sld [smem:[#allocation26_spill]] }
 0x13f   : > { %p1001_p4 = scmp.ge.s32.totalorder %s1858_s13, 2  ;;  %s760_s1 = sand.u32 1, %s1859_s29  }
 0x140   : > { %p1861_p7 = scmp.ne.s32.totalorder %s1860_s23, 0  ;;  %s761_s3 = scalar_lea.sflag [#allocation3], %s760_s1 }
 0x142   : > { %p988_p11 = pnand %p1001_p4, %p1861_p7 }
 0x144   : > { %1187 = dma.done.wait (!%p988_p11), %s761_s3, 256  }
 0x145   : > { %1189 = vsyncadd (!%p988_p11), %s761_s3, 4294967040  ;;  %s1862_s24 = sld [smem:[#allocation23_spill]]  ;;  %s1863_s21 = sld [smem:[#allocation19_spill]] }
 0x146   : > { %s1864_s22 = sld [smem:[#allocation20_spill]]  ;;  %s1865_s23 = sld [smem:[#allocation24_spill]] }
 0x14b   : > { %p20_p0 = scmp.ge.s32.totalorder %s1862_s24, 4  }
 0x14d   :  { %22 = sbr.rel (!%p20_p0) target bundleno = 15 (0xf), region = 104 }
 0x154   :  { %766 = vsyncpa [#allocation3], 1 }
 0x155   :  { %768 = vsyncpa [#allocation3 + $0x1], 1 }
 0x156   :  { %769 = vsyncpa [#allocation4], 1 }
 0x157   :  { %771 = vsyncpa [#allocation4 + $0x1], 1 }
 0x158   :  { %772 = vsyncpa [#allocation5], 1 }
 0x159   :  { %774 = vsyncpa [#allocation5 + $0x1], 1 }
 0x15a   :  { %775 = vsyncpa [#allocation8], 1 }
 0x15b   :  { %776 = vsyncpa [#allocation11], 1 }

</bundles_post_ra>
